<compile_context>
chip_gen: v7x
topology: tpu7x:2x2x1
jax: 0.10.0
libtpu: 0.0.40
codegen_flags: <defaults>
</compile_context>

<pallas_src>
import functools

import jax
import jax.numpy as jnp
from jax import lax
from jax.experimental import pallas as pl
from jax.experimental.pallas import tpu as pltpu

BN_EPS = 1e-5
NEG_SLOPE = 0.2          # LeakyReLU(0.2) from the reference module


def _round_up(v, m):
    return -(-v // m) * m


# ------------------------------ Pallas kernel ------------------------------ #
def _conv_bn_lrelu_kernel(x_ref, w_ref, s_ref, b_ref, o_ref, *,
                          tap_offsets, q_pad, neg_slope):
    """Fused Conv2d(bias=False) + folded BatchNorm + LeakyReLU for one image.

    x_ref : (1, Cin_p, L)        bf16  zero-padded image, rows flattened (stride Wp)
    w_ref : (Cout, K*K*Cin_p)    bf16  tap-major weight matrix
    s_ref : (Cout, 1)            f32   folded BN scale  gamma / sqrt(var + eps)
    b_ref : (Cout, 1)            f32   folded BN bias   beta - mean * scale
    o_ref : (1, Cout, Qp)        f32   Qp = Ho*Wp rounded up to a multiple of 128
    """
    x = x_ref[0]                                     # (Cin_p, L), VMEM resident
    # Stack the K*K statically-shifted lane slices along the sublane axis: the
    # im2col patch matrix (K*K*Cin_p, Qp) never exists in HBM, only in VMEM, and
    # every slice start is a static python int.
    patches = jnp.concatenate([x[:, d:d + q_pad] for d in tap_offsets], axis=0)
    # One full-depth MXU matmul, f32 accumulation.
    acc = jnp.dot(w_ref[...], patches, preferred_element_type=jnp.float32)
    y = acc * s_ref[...] + b_ref[...]                # folded BN (f32 epilogue)
    o_ref[0] = jnp.where(y >= 0, y, neg_slope * y)   # LeakyReLU(0.2), f32


# ------------------------------ forward pass ------------------------------- #
def discriminator_block_wgan(x, params, *, kernel_size=4, stride=1, padding=1):
    """DiscriminatorBlockWGAN.forward.  x: (N, Cin, H, W) f32 -> (N, Cout, Ho, Wo) f32."""
    w_oihw = params["conv_w"]                        # (Cout, Cin, Kh, Kw)
    batch, cin, h, w = x.shape
    cout, _, kh, kw = w_oihw.shape
    assert kh == kw == kernel_size

    pd = padding
    hp, wp = h + 2 * pd, w + 2 * pd
    ho1, wo1 = hp - kh + 1, wp - kw + 1              # stride-1 output size
    q_len = ho1 * wp                                 # valid lane span
    q_pad = _round_up(q_len, 128)                    # unmasked full-lane stores
    cin_p = _round_up(cin, 8)                        # sublane-align contraction
    kk = kh * kw
    tap_offsets = tuple(a * wp + b for a in range(kh) for b in range(kw))
    flat_len = tap_offsets[-1] + q_pad               # last shifted slice must fit

    # Cheap layout prep only (pad + free reshape + cast): no k^2 im2col blow-up.
    xpad = jnp.pad(x.astype(jnp.float32), ((0, 0), (0, 0), (pd, pd), (pd, pd)))
    xflat = xpad.reshape(batch, cin, hp * wp)
    xflat = jnp.pad(xflat, ((0, 0), (0, cin_p - cin), (0, flat_len - hp * wp)))
    xflat = xflat.astype(jnp.bfloat16)               # bf16 MXU operand

    # (Cout, Cin, Kh, Kw) -> (Cout, Kh, Kw, Cin_p) -> (Cout, Kh*Kw*Cin_p),
    # row order matching the tap-major patch stacking inside the kernel.
    w_r = jnp.transpose(w_oihw, (0, 2, 3, 1))
    w_r = jnp.pad(w_r, ((0, 0), (0, 0), (0, 0), (0, cin_p - cin)))
    w2d = w_r.reshape(cout, kk * cin_p).astype(jnp.bfloat16)

    scale = (params["bn_gamma"] * lax.rsqrt(params["bn_var"] + BN_EPS)).astype(jnp.float32)
    bias = (params["bn_beta"] - params["bn_mean"] * scale).astype(jnp.float32)

    kernel = functools.partial(_conv_bn_lrelu_kernel, tap_offsets=tap_offsets,
                               q_pad=q_pad, neg_slope=NEG_SLOPE)

    out_flat = pl.pallas_call(
        kernel,
        grid=(batch,),                               # per-image program
        in_specs=[
            pl.BlockSpec((1, cin_p, flat_len), lambda i: (i, 0, 0)),
            pl.BlockSpec((cout, kk * cin_p), lambda i: (0, 0)),
            pl.BlockSpec((cout, 1), lambda i: (0, 0)),
            pl.BlockSpec((cout, 1), lambda i: (0, 0)),
        ],
        out_specs=pl.BlockSpec((1, cout, q_pad), lambda i: (i, 0, 0)),
        out_shape=jax.ShapeDtypeStruct((batch, cout, q_pad), jnp.float32),
        compiler_params=pltpu.CompilerParams(
            dimension_semantics=("parallel",),       # megacore-shard batch on v7x
            vmem_limit_bytes=32 * 1024 * 1024,       # explicit, fits v5e/v6e/v7x
        ),
    )(xflat, w2d, scale.reshape(cout, 1), bias.reshape(cout, 1))

    # Drop the lane padding, de-stride rows (Wp -> Wo) and apply conv stride.
    # BN/LeakyReLU are pointwise, so spatial subsampling after them is exact.
    out = out_flat[:, :, :q_len].reshape(batch, cout, ho1, wp)[:, :, :, :wo1]
    if stride > 1:
        out = out[:, :, ::stride, ::stride]
    return out


# ------------------------------ reference & demo --------------------------- #
def _reference(x, params, *, stride=1, padding=1):
    out = lax.conv_general_dilated(
        x.astype(jnp.float32), params["conv_w"].astype(jnp.float32),
        window_strides=(stride, stride),
        padding=[(padding, padding), (padding, padding)],
        dimension_numbers=("NCHW", "OIHW", "NCHW"))
    scale = params["bn_gamma"] / jnp.sqrt(params["bn_var"] + BN_EPS)
    bias = params["bn_beta"] - params["bn_mean"] * scale
    out = out * scale[None, :, None, None] + bias[None, :, None, None]
    return jnp.where(out >= 0, out, NEG_SLOPE * out)


def init_params(key, inplanes, outplanes, kernel_size):
    k1, k2, k3, k4, k5 = jax.random.split(key, 5)
    return {
        "conv_w": 0.1 * jax.random.normal(
            k1, (outplanes, inplanes, kernel_size, kernel_size), jnp.float32),
        "bn_gamma": 1.0 + 0.1 * jax.random.normal(k2, (outplanes,), jnp.float32),
        "bn_beta": 0.1 * jax.random.normal(k3, (outplanes,), jnp.float32),
        "bn_mean": 0.1 * jax.random.normal(k4, (outplanes,), jnp.float32),
        "bn_var": 1.0 + 0.2 * jax.random.uniform(k5, (outplanes,), jnp.float32),
    }


if __name__ == "__main__":
    key = jax.random.PRNGKey(0)
    pkey, xkey = jax.random.split(key)

    inplanes, outplanes, ksize, stride, pad = 4, 32, 4, 1, 1      # module defaults
    params = init_params(pkey, inplanes, outplanes, ksize)
    x = jax.random.normal(xkey, (2, inplanes, 16, 16), jnp.float32)   # NCHW like PyTorch

    fwd = jax.jit(functools.partial(discriminator_block_wgan,
                                    kernel_size=ksize, stride=stride, padding=pad))
    out = fwd(x, params)
    jax.block_until_ready(out)

    ref = _reference(x, params, stride=stride, padding=pad)
    assert out.shape == ref.shape == (2, outplanes, 15, 15), out.shape
    assert out.dtype == jnp.float32
    # bf16 MXU operands vs. f32 XLA reference -> small tolerance.
    assert jnp.allclose(out, ref, atol=5e-2, rtol=5e-2), \
        float(jnp.max(jnp.abs(out - ref)))
    print("KERNEL_OK")
</pallas_src>

<mosaic_0001>
module attributes {stable_mosaic.version = 11 : i64} {
  func.func @_conv_bn_lrelu_kernel(%arg0: i32, %arg1: memref<1x8x441xbf16, #tpu.memory_space<vmem>>, %arg2: memref<32x128xbf16, #tpu.memory_space<vmem>>, %arg3: memref<32x1xf32, #tpu.memory_space<vmem>>, %arg4: memref<32x1xf32, #tpu.memory_space<vmem>>, %arg5: memref<1x32x384xf32, #tpu.memory_space<vmem>>) attributes {dimension_semantics = [#tpu.dimension_semantics<parallel>], iteration_bounds = array<i64: 2>, scalar_prefetch = 0 : i64, scratch_operands = 0 : i64, tpu.core_type = #tpu.core_type<tc>, window_params = [{transform_indices = @transform_0, window_bounds = array<i64: 1, 8, 441>}, {pipeline_mode = #tpu.pipeline_mode<synchronous>, transform_indices = @transform_1, window_bounds = array<i64: 32, 128>}, {pipeline_mode = #tpu.pipeline_mode<synchronous>, transform_indices = @transform_2, window_bounds = array<i64: 32, 1>}, {pipeline_mode = #tpu.pipeline_mode<synchronous>, transform_indices = @transform_3, window_bounds = array<i64: 32, 1>}, {transform_indices = @transform_4, window_bounds = array<i64: 1, 32, 384>}]} {
    %c0 = arith.constant 0 : index
    %c0_0 = arith.constant 0 : index
    %c0_1 = arith.constant 0 : index
    %0 = vector.load %arg1[%c0, %c0_0, %c0_1] : memref<1x8x441xbf16, #tpu.memory_space<vmem>>, vector<1x8x441xbf16>
    %1 = vector.shape_cast %0 : vector<1x8x441xbf16> to vector<8x441xbf16>
    %2 = vector.extract_strided_slice %1 {offsets = [0, 0], sizes = [8, 384], strides = [1, 1]} : vector<8x441xbf16> to vector<8x384xbf16>
    %3 = vector.extract_strided_slice %1 {offsets = [0, 1], sizes = [8, 384], strides = [1, 1]} : vector<8x441xbf16> to vector<8x384xbf16>
    %4 = vector.extract_strided_slice %1 {offsets = [0, 2], sizes = [8, 384], strides = [1, 1]} : vector<8x441xbf16> to vector<8x384xbf16>
    %5 = vector.extract_strided_slice %1 {offsets = [0, 3], sizes = [8, 384], strides = [1, 1]} : vector<8x441xbf16> to vector<8x384xbf16>
    %6 = vector.extract_strided_slice %1 {offsets = [0, 18], sizes = [8, 384], strides = [1, 1]} : vector<8x441xbf16> to vector<8x384xbf16>
    %7 = vector.extract_strided_slice %1 {offsets = [0, 19], sizes = [8, 384], strides = [1, 1]} : vector<8x441xbf16> to vector<8x384xbf16>
    %8 = vector.extract_strided_slice %1 {offsets = [0, 20], sizes = [8, 384], strides = [1, 1]} : vector<8x441xbf16> to vector<8x384xbf16>
    %9 = vector.extract_strided_slice %1 {offsets = [0, 21], sizes = [8, 384], strides = [1, 1]} : vector<8x441xbf16> to vector<8x384xbf16>
    %10 = vector.extract_strided_slice %1 {offsets = [0, 36], sizes = [8, 384], strides = [1, 1]} : vector<8x441xbf16> to vector<8x384xbf16>
    %11 = vector.extract_strided_slice %1 {offsets = [0, 37], sizes = [8, 384], strides = [1, 1]} : vector<8x441xbf16> to vector<8x384xbf16>
    %12 = vector.extract_strided_slice %1 {offsets = [0, 38], sizes = [8, 384], strides = [1, 1]} : vector<8x441xbf16> to vector<8x384xbf16>
    %13 = vector.extract_strided_slice %1 {offsets = [0, 39], sizes = [8, 384], strides = [1, 1]} : vector<8x441xbf16> to vector<8x384xbf16>
    %14 = vector.extract_strided_slice %1 {offsets = [0, 54], sizes = [8, 384], strides = [1, 1]} : vector<8x441xbf16> to vector<8x384xbf16>
    %15 = vector.extract_strided_slice %1 {offsets = [0, 55], sizes = [8, 384], strides = [1, 1]} : vector<8x441xbf16> to vector<8x384xbf16>
    %16 = vector.extract_strided_slice %1 {offsets = [0, 56], sizes = [8, 384], strides = [1, 1]} : vector<8x441xbf16> to vector<8x384xbf16>
    %17 = vector.extract_strided_slice %1 {offsets = [0, 57], sizes = [8, 384], strides = [1, 1]} : vector<8x441xbf16> to vector<8x384xbf16>
    %18 = tpu.concatenate %2, %3, %4, %5, %6, %7, %8, %9, %10, %11, %12, %13, %14, %15, %16, %17 in 0 : vector<8x384xbf16>, vector<8x384xbf16>, vector<8x384xbf16>, vector<8x384xbf16>, vector<8x384xbf16>, vector<8x384xbf16>, vector<8x384xbf16>, vector<8x384xbf16>, vector<8x384xbf16>, vector<8x384xbf16>, vector<8x384xbf16>, vector<8x384xbf16>, vector<8x384xbf16>, vector<8x384xbf16>, vector<8x384xbf16>, vector<8x384xbf16> -> vector<128x384xbf16>
    %c0_2 = arith.constant 0 : index
    %c0_3 = arith.constant 0 : index
    %19 = vector.load %arg2[%c0_2, %c0_3] : memref<32x128xbf16, #tpu.memory_space<vmem>>, vector<32x128xbf16>
    %cst = arith.constant dense<0.000000e+00> : vector<32x384xf32>
    %20 = tpu.matmul %19, %18, %cst {dimension_numbers = #tpu.dot_dimension_numbers<[1], [0], [0], [1], [0, 0, 1, 1], [], []>} : vector<32x128xbf16>, vector<128x384xbf16>, vector<32x384xf32> -> vector<32x384xf32>
    %c0_4 = arith.constant 0 : index
    %c0_5 = arith.constant 0 : index
    %21 = vector.load %arg3[%c0_4, %c0_5] : memref<32x1xf32, #tpu.memory_space<vmem>>, vector<32x1xf32>
    %22 = vector.broadcast %21 : vector<32x1xf32> to vector<32x384xf32>
    %23 = arith.mulf %20, %22 : vector<32x384xf32>
    %c0_6 = arith.constant 0 : index
    %c0_7 = arith.constant 0 : index
    %24 = vector.load %arg4[%c0_6, %c0_7] : memref<32x1xf32, #tpu.memory_space<vmem>>, vector<32x1xf32>
    %25 = vector.broadcast %24 : vector<32x1xf32> to vector<32x384xf32>
    %26 = arith.addf %23, %25 : vector<32x384xf32>
    %cst_8 = arith.constant 0.000000e+00 : f32
    %27 = vector.broadcast %cst_8 : f32 to vector<32x384xf32>
    %28 = arith.cmpf oge, %26, %27 : vector<32x384xf32>
    %cst_9 = arith.constant 2.000000e-01 : f32
    %29 = vector.broadcast %cst_9 : f32 to vector<32x384xf32>
    %30 = arith.mulf %29, %26 : vector<32x384xf32>
    %31 = arith.select %28, %26, %30 : vector<32x384xi1>, vector<32x384xf32>
    %c0_10 = arith.constant 0 : index
    %c0_11 = arith.constant 0 : index
    %c0_12 = arith.constant 0 : index
    %32 = vector.load %arg5[%c0_10, %c0_11, %c0_12] : memref<1x32x384xf32, #tpu.memory_space<vmem>>, vector<1x32x384xf32>
    %33 = vector.shape_cast %32 : vector<1x32x384xf32> to vector<32x384xf32>
    %34 = vector.shape_cast %31 : vector<32x384xf32> to vector<1x32x384xf32>
    tpu.vector_store %arg5[%c0_10, %c0_11, %c0_12], %34 {strides = array<i32>} : memref<1x32x384xf32, #tpu.memory_space<vmem>>, vector<1x32x384xf32>,
    return
  }
  func.func @transform_0(%arg0: i32) -> (i32, i32, i32) {
    %c0_i32 = arith.constant 0 : i32
    %c0_i32_0 = arith.constant 0 : i32
    %c0_i32_1 = arith.constant 0 : i32
    return %arg0, %c0_i32, %c0_i32_0 : i32, i32, i32
  }
  func.func @transform_1(%arg0: i32) -> (i32, i32) {
    %c0_i32 = arith.constant 0 : i32
    %c0_i32_0 = arith.constant 0 : i32
    %c0_i32_1 = arith.constant 0 : i32
    return %c0_i32, %c0_i32_0 : i32, i32
  }
  func.func @transform_2(%arg0: i32) -> (i32, i32) {
    %c0_i32 = arith.constant 0 : i32
    %c0_i32_0 = arith.constant 0 : i32
    %c0_i32_1 = arith.constant 0 : i32
    return %c0_i32, %c0_i32_0 : i32, i32
  }
  func.func @transform_3(%arg0: i32) -> (i32, i32) {
    %c0_i32 = arith.constant 0 : i32
    %c0_i32_0 = arith.constant 0 : i32
    %c0_i32_1 = arith.constant 0 : i32
    return %c0_i32, %c0_i32_0 : i32, i32
  }
  func.func @transform_4(%arg0: i32) -> (i32, i32, i32) {
    %c0_i32 = arith.constant 0 : i32
    %c0_i32_0 = arith.constant 0 : i32
    %c0_i32_1 = arith.constant 0 : i32
    return %arg0, %c0_i32, %c0_i32_0 : i32, i32, i32
  }
}

</mosaic_0001>

<bundles_post_ra>
// kernel: discriminator_block_wgan.1
= control target key start
LH: loop header
LB: loop body
LE: loop exit
PB: predicated region body
PF: predicated region fallthrough
CT: control target
= control target key end

     0   :  { %s910_s15 = smov 0   ;;  %s1133_s0 = inlined_call_operand.vmem [shape: bf16[2,8,441], index: 0, kind: input, shape index: {}]   ;;  %s1134_s1 = inlined_call_operand.vmem [shape: bf16[32,128], index: 1, kind: input, shape index: {}]   ;;  %s1135_s2 = inlined_call_operand.vmem [shape: f32[32,1], index: 2, kind: input, shape index: {}]   ;;  %s1136_s3 = inlined_call_operand.vmem [shape: f32[32,1], index: 3, kind: input, shape index: {}]   ;;  %s1137_s4 = inlined_call_operand.vmem [shape: f32[2,32,384], index: 4, kind: output, shape index: {}]  }
   0x1 LB: > { %s781_s16 = sadd.s32 4294967295, %s867_s15   ;;  %p785_p0 = scmp.ge.s32.totalorder %s867_s15, 1  ;;  %s867_s15 = sphi %s910_s15, %s14_s15  }
   0x2   : > { %p162_p1 = scmp.lt.s32.totalorder %s867_s15, 3 }
   0x4   : > { %p163_p2 = pnand %p785_p0, %p162_p1 }
   0x5   : > { %p188_p3 = scmp.lt.s32.totalorder (!%p163_p2), %s781_s16, 1  ;;  %s869_s21 = smov (!%p163_p2), 127   ;;  %v882_v6 = vmov (!%p163_p2), 0   ;;  %v986_v7 = vld [vmem:[%s1134_s1] sm:$0xff] (!%p163_p2)   ;;  %vm219_vm0 = vcmask (!%p163_p2), 1039360   ;;  %v607_v11 = vld [vmem:[%s1135_s2 + $0x8] sm:$0xff] (!%p163_p2) }
   0x6   : > { %166 = sbr.rel (%p163_p2) target bundleno = 483 (0x1e3), region = 36  ;;  %s870_s22 = smov (!%p163_p2), 126   ;;  %536 = vmatprep.mubr.bf16.mxu0 (!%p163_p2), %v882_v6  ;;  %854 = vset.pattern.permute.xlu1 (!%p163_p2), %v882_v6  ;;  %v606_v10 = vld [vmem:[%s1135_s2] sm:$0xff] (!%p163_p2)  ;;  %vm391_vm1 = vcmask (!%p163_p2), 1043456   ;;  %v609_v18 = vld [vmem:[%s1135_s2 + $0x18] sm:$0xff] (!%p163_p2)  ;;  %v608_v19 = vld [vmem:[%s1135_s2 + $0x10] sm:$0xff] (!%p163_p2) }
   0x7   : > { %s871_s23 = smov (!%p163_p2), 125   ;;  %s872_s24 = smov (!%p163_p2), 110   ;;  %824 = vmatprep.mubr.bf16.mxu1 (!%p163_p2), %v986_v7  ;;  %853 = vset.pattern.permute.xlu0 (!%p163_p2), %v882_v6  ;;  %vm231_vm2 = vcmask (!%p163_p2), 1031168   ;;  %vm243_vm3 = vcmask (!%p163_p2), 1022976   ;;  %v643_v22 = vld [vmem:[%s1136_s3 + $0x8] sm:$0xff] (!%p163_p2)  ;;  %v642_v23 = vld [vmem:[%s1136_s3] sm:$0xff] (!%p163_p2) }
   0x8   : > { %s873_s25 = smov (!%p163_p2), 109   ;;  %s874_s26 = smov (!%p163_p2), 108   ;;  %v645_v29 = vld [vmem:[%s1136_s3 + $0x18] sm:$0xff] (!%p163_p2)  ;;  %v644_v30 = vld [vmem:[%s1136_s3 + $0x10] sm:$0xff] (!%p163_p2)  ;;  %vm255_vm4 = vcmask (!%p163_p2), 900096   ;;  %vm267_vm5 = vcmask (!%p163_p2), 891904  }
   0x9   : > { %s875_s27 = smov (!%p163_p2), 107   ;;  %s876_s28 = smov (!%p163_p2), 92   ;;  %vm279_vm6 = vcmask (!%p163_p2), 883712   ;;  %vm291_vm7 = vcmask (!%p163_p2), 875520   ;;  %vm303_vm8 = vcmask (!%p163_p2), 752640   ;;  %vm315_vm9 = vcmask (!%p163_p2), 744448  }
   0xa   : > { %s877_s29 = smov (!%p163_p2), 91   ;;  %s878_s30 = smov (!%p163_p2), 90   ;;  %vm327_vm10 = vcmask (!%p163_p2), 736256   ;;  %vm339_vm11 = vcmask (!%p163_p2), 728064   ;;  %vm351_vm12 = vcmask (!%p163_p2), 605184   ;;  %vm363_vm13 = vcmask (!%p163_p2), 596992  }
   0xb   : > { %s879_s5 = smov (!%p163_p2), 89   ;;  %s880_s6 = smov (!%p163_p2), 74   ;;  %vm375_vm14 = vcmask (!%p163_p2), 588800   ;;  %vm387_vm15 = vcmask (!%p163_p2), 580608  }
   0xc   : > { %s881_s7 = smov (!%p163_p2), 73   ;;  %s883_s10 = smov (!%p163_p2), 72  }
   0xd   : > { %s1139_s16 = smov (!%p188_p3, %s781_s16), 1  ;;  %s884_s11 = smov 71  }
   0xe   : > { %s797_s17 = sshll.u32 %s1139_s16, 4 }
   0xf   : > { %s192_s20 = scalar_lea.vmem %s1133_s0, %s797_s17 }
  0x10   : > { %v199_v0 = vld [vmem:[%s192_s20] sm:$0xff]  ;;  %v200_v1 = vld [vmem:[%s192_s20 + $0x8] sm:$0xff] }
  0x11   : > { %v924_v2 = vcombine.high %v199_v0, %v199_v0  ;;  %v926_v3 = vcombine.low %v199_v0, %v199_v0  ;;  %v930_v4 = vcombine.low %v200_v1, %v200_v1  ;;  %v938_v5 = vcombine.high %v200_v1, %v200_v1 }
  0x13   : > { %213 = vrot.lane.b32.xlu0 %v924_v2, %s869_s21  ;;  %211 = vrot.lane.b32.xlu1 %v926_v3, %s869_s21 }
  0x17   : > { %215 = vrot.lane.b32.xlu0 %v930_v4, %s869_s21  ;;  %225 = vrot.lane.b32.xlu1 %v924_v2, %s870_s22 }
  0x1b   : > { %227 = vrot.lane.b32.xlu0 %v930_v4, %s870_s22  ;;  %237 = vrot.lane.b32.xlu1 %v924_v2, %s871_s23 }
  0x1f   : > { %239 = vrot.lane.b32.xlu0 %v930_v4, %s871_s23  ;;  %223 = vrot.lane.b32.xlu1 %v926_v3, %s870_s22 }
  0x23   : > { %235 = vrot.lane.b32.xlu0 %v926_v3, %s871_s23  ;;  %217 = vrot.lane.b32.xlu1 %v938_v5, %s869_s21 }
  0x27   : > { %249 = vrot.lane.b32.xlu0 %v924_v2, %s872_s24  ;;  %251 = vrot.lane.b32.xlu1 %v930_v4, %s872_s24 }
  0x2b   : > { %261 = vrot.lane.b32.xlu0 %v924_v2, %s873_s25  ;;  %263 = vrot.lane.b32.xlu1 %v930_v4, %s873_s25 }
  0x2f   : > { %247 = vrot.lane.b32.xlu0 %v926_v3, %s872_s24  ;;  %259 = vrot.lane.b32.xlu1 %v926_v3, %s873_s25 }
  0x33   : > { %229 = vrot.lane.b32.xlu0 %v938_v5, %s870_s22  ;;  %241 = vrot.lane.b32.xlu1 %v938_v5, %s871_s23 }
  0x37   : > { %273 = vrot.lane.b32.xlu0 %v924_v2, %s874_s26  ;;  %275 = vrot.lane.b32.xlu1 %v930_v4, %s874_s26 }
  0x3b   : > { %285 = vrot.lane.b32.xlu0 %v924_v2, %s875_s27  ;;  %287 = vrot.lane.b32.xlu1 %v930_v4, %s875_s27 }
  0x3f   : > { %271 = vrot.lane.b32.xlu0 %v926_v3, %s874_s26  ;;  %283 = vrot.lane.b32.xlu1 %v926_v3, %s875_s27 }
  0x43   : > { %253 = vrot.lane.b32.xlu0 %v938_v5, %s872_s24  ;;  %265 = vrot.lane.b32.xlu1 %v938_v5, %s873_s25 }
  0x47   : > { %297 = vrot.lane.b32.xlu0 %v924_v2, %s876_s28  ;;  %299 = vrot.lane.b32.xlu1 %v930_v4, %s876_s28 }
  0x4b   : > { %309 = vrot.lane.b32.xlu0 %v924_v2, %s877_s29  ;;  %311 = vrot.lane.b32.xlu1 %v930_v4, %s877_s29 }
  0x4f   : > { %295 = vrot.lane.b32.xlu0 %v926_v3, %s876_s28  ;;  %307 = vrot.lane.b32.xlu1 %v926_v3, %s877_s29 }
  0x53   : > { %277 = vrot.lane.b32.xlu0 %v938_v5, %s874_s26  ;;  %289 = vrot.lane.b32.xlu1 %v938_v5, %s875_s27 }
  0x57   : > { %321 = vrot.lane.b32.xlu0 %v924_v2, %s878_s30  ;;  %323 = vrot.lane.b32.xlu1 %v930_v4, %s878_s30 }
  0x5b   : > { %333 = vrot.lane.b32.xlu0 %v924_v2, %s879_s5  ;;  %335 = vrot.lane.b32.xlu1 %v930_v4, %s879_s5 }
  0x5f   : > { %319 = vrot.lane.b32.xlu0 %v926_v3, %s878_s30  ;;  %331 = vrot.lane.b32.xlu1 %v926_v3, %s879_s5 }
  0x63   : > { %301 = vrot.lane.b32.xlu0 %v938_v5, %s876_s28  ;;  %313 = vrot.lane.b32.xlu1 %v938_v5, %s877_s29 }
  0x67   : > { %345 = vrot.lane.b32.xlu0 %v924_v2, %s880_s6  ;;  %347 = vrot.lane.b32.xlu1 %v930_v4, %s880_s6 }
  0x6b   : > { %357 = vrot.lane.b32.xlu0 %v924_v2, %s881_s7  ;;  %359 = vrot.lane.b32.xlu1 %v930_v4, %s881_s7 }
  0x6f   : > { %343 = vrot.lane.b32.xlu0 %v926_v3, %s880_s6  ;;  %355 = vrot.lane.b32.xlu1 %v926_v3, %s881_s7 }
  0x73   : > { %325 = vrot.lane.b32.xlu0 %v938_v5, %s878_s30  ;;  %337 = vrot.lane.b32.xlu1 %v938_v5, %s879_s5 }
  0x77   : > { %369 = vrot.lane.b32.xlu0 %v924_v2, %s883_s10  ;;  %371 = vrot.lane.b32.xlu1 %v930_v4, %s883_s10 }
  0x7b   : > { %381 = vrot.lane.b32.xlu0 %v924_v2, %s884_s11  ;;  %383 = vrot.lane.b32.xlu1 %v930_v4, %s884_s11 }
  0x7f   : > { %367 = vrot.lane.b32.xlu0 %v926_v3, %s883_s10  ;;  %379 = vrot.lane.b32.xlu1 %v926_v3, %s884_s11 }
  0x83   : > { %349 = vrot.lane.b32.xlu0 %v938_v5, %s880_s6  ;;  %361 = vrot.lane.b32.xlu1 %v938_v5, %s881_s7  ;;  %s828_s6 = smul.u32 96, %s1139_s16 }
  0x85   : > { %v214_v8 = vpop.permute.xlu0 %213  ;;  %v212_v9 = vpop.permute.xlu1 %211  ;;  %s1112_s9 = scalar_lea.vmem %s1137_s4, %s828_s6 }
  0x86   : > { %v220_v12 = vsel %vm219_vm0, %v212_v9, %v214_v8 }
  0x87   : > { %373 = vrot.lane.b32.xlu0 %v938_v5, %s883_s10  ;;  %385 = vrot.lane.b32.xlu1 %v938_v5, %s884_s11  ;;  %v394_v17 = vsel %vm391_vm1, %v926_v3, %v220_v12 }
  0x89   : > { %v216_v13 = vpop.permute.xlu0 %215  ;;  %v226_v14 = vpop.permute.xlu1 %225 }
  0x8a   : > { %v221_v15 = vsel %vm219_vm0, %v214_v8, %v216_v13 }
  0x8b   : > { %v398_v16 = vsel %vm391_vm1, %v924_v2, %v221_v15  ;;  %612 = vperm.xlu0 %853, %v606_v10   ;;  %617 = vperm.xlu1 %854, %v607_v11  }
  0x8c   : > { %504 = vmatprep.subr.bf16.mxu0 %v398_v16 }
  0x8d   : > { %v228_v20 = vpop.permute.xlu0 %227  ;;  %505 = vmatpush1.bf16.msra.mxu0 %v394_v17  ;;  %v238_v21 = vpop.permute.xlu1 %237 }
  0x8e   : > { %v233_v26 = vsel %vm231_vm2, %v226_v14, %v228_v20 }
  0x8f   : > { %627 = vperm.xlu0 %853, %v609_v18   ;;  %622 = vperm.xlu1 %854, %v608_v19  }
  0x91   : > { %v240_v24 = vpop.permute.xlu0 %239  ;;  %v224_v25 = vpop.permute.xlu1 %223 }
  0x92   : > { %v245_v27 = vsel %vm243_vm3, %v238_v21, %v240_v24  ;;  %v232_v33 = vsel %vm231_vm2, %v224_v25, %v226_v14 }
  0x93   : > { %v410_v28 = vsel %vm391_vm1, %v233_v26, %v245_v27  ;;  %653 = vperm.xlu0 %853, %v643_v22   ;;  %648 = vperm.xlu1 %854, %v642_v23  }
  0x94   : > { %506 = vmatprep.subr.bf16.mxu0 %v410_v28 }
  0x95   : > { %v236_v31 = vpop.permute.xlu0 %235  ;;  %v218_v32 = vpop.permute.xlu1 %217 }
  0x96   : > { %v244_v34 = vsel %vm243_vm3, %v236_v31, %v238_v21  ;;  %v222_v35 = vsel %vm219_vm0, %v216_v13, %v218_v32 }
  0x97   : > { %v406_v36 = vsel %vm391_vm1, %v232_v33, %v244_v34  ;;  %v402_v37 = vsel %vm391_vm1, %v930_v4, %v222_v35  ;;  %663 = vperm.xlu0 %853, %v645_v29   ;;  %658 = vperm.xlu1 %854, %v644_v30  }
  0x98   : > { %507 = vmatpush1.bf16.msra.mxu0 %v406_v36  ;;  %808 = vmatprep.subr.bf16.mxu1 %v402_v37 }
  0x99   : > { %v250_v38 = vpop.permute.xlu0 %249  ;;  %809 = vmatpush3.bf16.msra.mxu1 %v402_v37  ;;  %v252_v39 = vpop.permute.xlu1 %251 }
  0x9a   : > { %v257_v42 = vsel %vm255_vm4, %v250_v38, %v252_v39 }
  0x9d   : > { %v262_v40 = vpop.permute.xlu0 %261  ;;  %v264_v41 = vpop.permute.xlu1 %263 }
  0x9e   : > { %v269_v43 = vsel %vm267_vm5, %v262_v40, %v264_v41 }
  0x9f   : > { %v422_v44 = vsel %vm391_vm1, %v257_v42, %v269_v43 }
  0xa0   : > { %508 = vmatprep.subr.bf16.mxu0 %v422_v44 }
  0xa1   : > { %v248_v45 = vpop.permute.xlu0 %247  ;;  %v260_v46 = vpop.permute.xlu1 %259 }
  0xa2   : > { %v256_v47 = vsel %vm255_vm4, %v248_v45, %v250_v38  ;;  %v268_v48 = vsel %vm267_vm5, %v260_v46, %v262_v40 }
  0xa3   : > { %v418_v49 = vsel %vm391_vm1, %v256_v47, %v268_v48 }
  0xa4   : > { %509 = vmatpush1.bf16.msra.mxu0 %v418_v49 }
  0xa5   : > { %v230_v50 = vpop.permute.xlu0 %229  ;;  %v242_v51 = vpop.permute.xlu1 %241 }
  0xa6   : > { %v234_v52 = vsel %vm231_vm2, %v228_v20, %v230_v50  ;;  %v246_v53 = vsel %vm243_vm3, %v240_v24, %v242_v51 }
  0xa7   : > { %v414_v54 = vsel %vm391_vm1, %v234_v52, %v246_v53 }
  0xa8   : > { %810 = vmatprep.subr.bf16.mxu1 %v414_v54 }
  0xa9   : > { %v274_v55 = vpop.permute.xlu0 %273  ;;  %811 = vmatpush3.bf16.msra.mxu1 %v414_v54  ;;  %v276_v56 = vpop.permute.xlu1 %275 }
  0xaa   : > { %v281_v59 = vsel %vm279_vm6, %v274_v55, %v276_v56 }
  0xad   : > { %v286_v57 = vpop.permute.xlu0 %285  ;;  %v288_v58 = vpop.permute.xlu1 %287 }
  0xae   : > { %v293_v60 = vsel %vm291_vm7, %v286_v57, %v288_v58 }
  0xaf   : > { %v434_v61 = vsel %vm391_vm1, %v281_v59, %v293_v60 }
  0xb0   : > { %510 = vmatprep.subr.bf16.mxu0 %v434_v61 }
  0xb1   : > { %v272_v62 = vpop.permute.xlu0 %271  ;;  %v284_v63 = vpop.permute.xlu1 %283 }
  0xb2   : > { %v280_v0 = vsel %vm279_vm6, %v272_v62, %v274_v55  ;;  %v292_v1 = vsel %vm291_vm7, %v284_v63, %v286_v57 }
  0xb3   : > { %v430_v2 = vsel %vm391_vm1, %v280_v0, %v292_v1 }
  0xb4   : > { %511 = vmatpush1.bf16.msra.mxu0 %v430_v2 }
  0xb5   : > { %v254_v3 = vpop.permute.xlu0 %253  ;;  %v266_v4 = vpop.permute.xlu1 %265 }
  0xb6   : > { %v258_v5 = vsel %vm255_vm4, %v252_v39, %v254_v3  ;;  %v270_v8 = vsel %vm267_vm5, %v264_v41, %v266_v4 }
  0xb7   : > { %v426_v9 = vsel %vm391_vm1, %v258_v5, %v270_v8 }
  0xb8   : > { %812 = vmatprep.subr.bf16.mxu1 %v426_v9 }
  0xb9   : > { %v298_v10 = vpop.permute.xlu0 %297  ;;  %813 = vmatpush3.bf16.msra.mxu1 %v426_v9  ;;  %v300_v11 = vpop.permute.xlu1 %299 }
  0xba   : > { %v305_v14 = vsel %vm303_vm8, %v298_v10, %v300_v11 }
  0xbd   : > { %v310_v12 = vpop.permute.xlu0 %309  ;;  %v312_v13 = vpop.permute.xlu1 %311 }
  0xbe   : > { %v317_v15 = vsel %vm315_vm9, %v310_v12, %v312_v13 }
  0xbf   : > { %v446_v16 = vsel %vm391_vm1, %v305_v14, %v317_v15 }
  0xc0   : > { %512 = vmatprep.subr.bf16.mxu0 %v446_v16 }
  0xc1   : > { %v296_v17 = vpop.permute.xlu0 %295  ;;  %v308_v18 = vpop.permute.xlu1 %307 }
  0xc2   : > { %v304_v19 = vsel %vm303_vm8, %v296_v17, %v298_v10  ;;  %v316_v20 = vsel %vm315_vm9, %v308_v18, %v310_v12 }
  0xc3   : > { %v442_v21 = vsel %vm391_vm1, %v304_v19, %v316_v20 }
  0xc4   : > { %513 = vmatpush1.bf16.msra.mxu0 %v442_v21  ;;  %v860_v21 = vld [vmem:[%s1134_s1 + $0x8] sm:$0xff]  }
  0xc5   : > { %v278_v22 = vpop.permute.xlu0 %277  ;;  %v290_v23 = vpop.permute.xlu1 %289 }
  0xc6   : > { %v282_v24 = vsel %vm279_vm6, %v276_v56, %v278_v22  ;;  %v294_v25 = vsel %vm291_vm7, %v288_v58, %v290_v23 }
  0xc7   : > { %v438_v26 = vsel %vm391_vm1, %v282_v24, %v294_v25 }
  0xc8   : > { %814 = vmatprep.subr.bf16.mxu1 %v438_v26 }
  0xc9   : > { %v322_v27 = vpop.permute.xlu0 %321  ;;  %815 = vmatpush3.bf16.msra.mxu1 %v438_v26  ;;  %v324_v28 = vpop.permute.xlu1 %323 }
  0xca   : > { %v329_v31 = vsel %vm327_vm10, %v322_v27, %v324_v28 }
  0xcd   : > { %v334_v29 = vpop.permute.xlu0 %333  ;;  %v336_v30 = vpop.permute.xlu1 %335 }
  0xce   : > { %v341_v32 = vsel %vm339_vm11, %v334_v29, %v336_v30 }
  0xcf   : > { %v458_v33 = vsel %vm391_vm1, %v329_v31, %v341_v32 }
  0xd0   : > { %514 = vmatprep.subr.bf16.mxu0 %v458_v33 }
  0xd1   : > { %v320_v34 = vpop.permute.xlu0 %319  ;;  %v332_v35 = vpop.permute.xlu1 %331 }
  0xd2   : > { %v328_v36 = vsel %vm327_vm10, %v320_v34, %v322_v27  ;;  %v340_v37 = vsel %vm339_vm11, %v332_v35, %v334_v29 }
  0xd3   : > { %v454_v38 = vsel %vm391_vm1, %v328_v36, %v340_v37 }
  0xd4   : > { %515 = vmatpush1.bf16.msra.mxu0 %v454_v38 }
  0xd5   : > { %v302_v39 = vpop.permute.xlu0 %301  ;;  %v314_v40 = vpop.permute.xlu1 %313 }
  0xd6   : > { %v306_v41 = vsel %vm303_vm8, %v300_v11, %v302_v39  ;;  %v318_v42 = vsel %vm315_vm9, %v312_v13, %v314_v40 }
  0xd7   : > { %v450_v43 = vsel %vm391_vm1, %v306_v41, %v318_v42 }
  0xd8   : > { %816 = vmatprep.subr.bf16.mxu1 %v450_v43 }
  0xd9   : > { %v346_v44 = vpop.permute.xlu0 %345  ;;  %817 = vmatpush3.bf16.msra.mxu1 %v450_v43  ;;  %v348_v45 = vpop.permute.xlu1 %347 }
  0xda   : > { %v353_v48 = vsel %vm351_vm12, %v346_v44, %v348_v45 }
  0xdd   : > { %v358_v46 = vpop.permute.xlu0 %357  ;;  %v360_v47 = vpop.permute.xlu1 %359 }
  0xde   : > { %v365_v49 = vsel %vm363_vm13, %v358_v46, %v360_v47 }
  0xdf   : > { %v470_v50 = vsel %vm391_vm1, %v353_v48, %v365_v49 }
  0xe0   : > { %516 = vmatprep.subr.bf16.mxu0 %v470_v50 }
  0xe1   : > { %v344_v51 = vpop.permute.xlu0 %343  ;;  %v356_v52 = vpop.permute.xlu1 %355 }
  0xe2   : > { %v352_v53 = vsel %vm351_vm12, %v344_v51, %v346_v44  ;;  %v364_v54 = vsel %vm363_vm13, %v356_v52, %v358_v46 }
  0xe3   : > { %v466_v55 = vsel %vm391_vm1, %v352_v53, %v364_v54 }
  0xe4   : > { %517 = vmatpush1.bf16.msra.mxu0 %v466_v55 }
  0xe5   : > { %v326_v56 = vpop.permute.xlu0 %325  ;;  %v338_v57 = vpop.permute.xlu1 %337 }
  0xe6   : > { %v330_v58 = vsel %vm327_vm10, %v324_v28, %v326_v56  ;;  %v342_v59 = vsel %vm339_vm11, %v336_v30, %v338_v57 }
  0xe7   : > { %v462_v60 = vsel %vm391_vm1, %v330_v58, %v342_v59 }
  0xe8   : > { %818 = vmatprep.subr.bf16.mxu1 %v462_v60 }
  0xe9   : > { %v370_v61 = vpop.permute.xlu0 %369  ;;  %819 = vmatpush3.bf16.msra.mxu1 %v462_v60  ;;  %v372_v62 = vpop.permute.xlu1 %371 }
  0xea   : > { %v377_v1 = vsel %vm375_vm14, %v370_v61, %v372_v62 }
  0xed   : > { %v382_v63 = vpop.permute.xlu0 %381  ;;  %v384_v0 = vpop.permute.xlu1 %383 }
  0xee   : > { %v389_v2 = vsel %vm387_vm15, %v382_v63, %v384_v0 }
  0xef   : > { %v482_v3 = vsel %vm391_vm1, %v377_v1, %v389_v2 }
  0xf0   : > { %518 = vmatprep.subr.bf16.mxu0 %v482_v3 }
  0xf1   : > { %v368_v4 = vpop.permute.xlu0 %367  ;;  %v380_v5 = vpop.permute.xlu1 %379 }
  0xf2   : > { %v376_v8 = vsel %vm375_vm14, %v368_v4, %v370_v61  ;;  %v388_v9 = vsel %vm387_vm15, %v380_v5, %v382_v63 }
  0xf3   : > { %v478_v10 = vsel %vm391_vm1, %v376_v8, %v388_v9 }
  0xf4   : > { %519 = vmatpush1.bf16.msra.mxu0 %v478_v10 }
  0xf5   : > { %v350_v11 = vpop.permute.xlu0 %349  ;;  %v362_v12 = vpop.permute.xlu1 %361 }
  0xf6   : > { %v354_v13 = vsel %vm351_vm12, %v348_v45, %v350_v11  ;;  %v366_v14 = vsel %vm363_vm13, %v360_v47, %v362_v12 }
  0xf7   : > { %537 = vmatmul.mubr.bf16.vlgmr.msra.gmra.mrb[0].mxu0 %v986_v7  ;;  %v474_v15 = vsel %vm391_vm1, %v354_v13, %v366_v14 }
  0xf8   : > { %820 = vmatprep.subr.bf16.mxu1 %v474_v15  ;;  %546 = vmatprep.mubr.bf16.mxu0 %v882_v6 }
  0xf9   : > { %v374_v16 = vpop.permute.xlu0 %373  ;;  %821 = vmatpush3.bf16.msra.mxu1 %v474_v15  ;;  %v386_v17 = vpop.permute.xlu1 %385 }
  0xfa   : > { %v378_v18 = vsel %vm375_vm14, %v372_v62, %v374_v16  ;;  %v390_v19 = vsel %vm387_vm15, %v384_v0, %v386_v17 }
  0xfb   : > { %v486_v20 = vsel %vm391_vm1, %v378_v18, %v390_v19 }
  0xfc   : > { %822 = vmatprep.subr.bf16.mxu1 %v486_v20 }
  0xfd   : > { %823 = vmatpush3.bf16.msra.mxu1 %v486_v20 }
  0xff   : > { %547 = vmatmul.mubr.bf16.gmra.mrb[4].mxu0 %v860_v21 }
 0x100   : > { %825 = vmatmul.mubr.bf16.vlgmr.msra.gmra.mrb[0].mxu1 %v860_v21 }
 0x10a   : > { %v1102_v7 = vpop.permute.xlu1 %617  ;;  %v613_v6 = vpop.permute.xlu0 %612 }
 0x10e   : > { %v623_v22 = vpop.permute.xlu1 %622  ;;  %v628_v23 = vpop.permute.xlu0 %627 }
 0x112   : > { %v649_v27 = vpop.permute.xlu1 %648  ;;  %v1106_v33 = vpop.permute.xlu0 %653 }
 0x116   : > { %v659_v43 = vpop.permute.xlu1 %658  ;;  %v664_v60 = vpop.permute.xlu0 %663 }
 0x1ca   : > { %v538_v24 = vpop.f32.mrb[0].mxu0 }
 0x1cb   : > { %v630_v25 = vmul.f32 %v613_v6, %v538_v24  ;;  %v540_v26 = vpop.f32.mrb[1].mxu0 }
 0x1cc   : > { %v631_v28 = vmul.f32 %v613_v6, %v540_v26  ;;  %v542_v29 = vpop.f32.mrb[2].mxu0 }
 0x1cd   : > { %v666_v30 = vadd.f32 %v649_v27, %v630_v25  ;;  %v633_v31 = vmul.f32 %v1102_v7, %v542_v29  ;;  %v544_v32 = vpop.f32.mrb[3].mxu0 }
 0x1ce   : > { %v667_v34 = vadd.f32 %v649_v27, %v631_v28  ;;  %v634_v35 = vmul.f32 %v1102_v7, %v544_v32 }
 0x1cf   : > { %vm678_vm0 = vcmp.ge.f32.partialorder %v666_v30, 0.0  ;;  %v690_v36 = vmul.f32 0.2, %v666_v30  ;;  %v669_v37 = vadd.f32 %v1106_v33, %v633_v31 }
 0x1d0   : > { %vm679_vm1 = vcmp.ge.f32.partialorder %v667_v34, 0.0  ;;  %v691_v38 = vmul.f32 0.2, %v667_v34  ;;  %v670_v39 = vadd.f32 %v1106_v33, %v634_v35 }
 0x1d1   : > { %v702_v40 = vsel %vm678_vm0, %v666_v30, %v690_v36  ;;  %vm681_vm2 = vcmp.ge.f32.partialorder %v669_v37, 0.0  ;;  %v693_v41 = vmul.f32 0.2, %v669_v37 }
 0x1d2   : > { %714 = vst [vmem:[%s1112_s9] sm:$0xff] %v702_v40  ;;  %v703_v42 = vsel %vm679_vm1, %v667_v34, %v691_v38  ;;  %vm682_vm3 = vcmp.ge.f32.partialorder %v670_v39, 0.0  ;;  %v694_v44 = vmul.f32 0.2, %v670_v39  ;;  %v548_v45 = vpop.f32.mrb[4].mxu0 }
 0x1d3   : > { %715 = vst [vmem:[%s1112_s9 + $0x8] sm:$0xff] %v703_v42  ;;  %v705_v46 = vsel %vm681_vm2, %v669_v37, %v693_v41  ;;  %v636_v47 = vmul.f32 %v623_v22, %v548_v45  ;;  %v550_v48 = vpop.f32.mrb[5].mxu0  ;;  %v826_v49 = vpop.f32.mrb[0].mxu1 }
 0x1d4   : > { %717 = vst [vmem:[%s1112_s9 + $0x18] sm:$0xff] %v705_v46  ;;  %v706_v50 = vsel %vm682_vm3, %v670_v39, %v694_v44  ;;  %v637_v51 = vmul.f32 %v623_v22, %v550_v48  ;;  %v638_v52 = vmul.f32 %v826_v49, %v623_v22  ;;  %v552_v53 = vpop.f32.mrb[6].mxu0  ;;  %v591_v54 = vpop.f32.mrb[1].mxu1 }
 0x1d5   : > { %718 = vst [vmem:[%s1112_s9 + $0x20] sm:$0xff] %v706_v50  ;;  %v672_v55 = vadd.f32 %v659_v43, %v636_v47  ;;  %v639_v56 = vmul.f32 %v628_v23, %v552_v53  ;;  %v632_v57 = vmul.f32 %v613_v6, %v591_v54  ;;  %v554_v58 = vpop.f32.mrb[7].mxu0  ;;  %v827_v59 = vpop.f32.mrb[2].mxu1 }
 0x1d6   : > { %v673_v61 = vadd.f32 %v659_v43, %v637_v51  ;;  %v674_v62 = vadd.f32 %v659_v43, %v638_v52  ;;  %v640_v63 = vmul.f32 %v628_v23, %v554_v58  ;;  %v641_v0 = vmul.f32 %v827_v59, %v628_v23  ;;  %v594_v1 = vpop.f32.mrb[3].mxu1 }
 0x1d7   : > { %vm684_vm4 = vcmp.ge.f32.partialorder %v672_v55, 0.0  ;;  %v696_v2 = vmul.f32 0.2, %v672_v55  ;;  %v675_v3 = vadd.f32 %v664_v60, %v639_v56  ;;  %v668_v4 = vadd.f32 %v649_v27, %v632_v57 }
 0x1d8   : > { %vm685_vm5 = vcmp.ge.f32.partialorder %v673_v61, 0.0  ;;  %v697_v5 = vmul.f32 0.2, %v673_v61  ;;  %vm686_vm6 = vcmp.ge.f32.partialorder %v674_v62, 0.0  ;;  %v698_v8 = vmul.f32 0.2, %v674_v62 }
 0x1d9   : > { %v708_v9 = vsel %vm684_vm4, %v672_v55, %v696_v2  ;;  %vm687_vm7 = vcmp.ge.f32.partialorder %v675_v3, 0.0  ;;  %v699_v10 = vmul.f32 0.2, %v675_v3  ;;  %vm680_vm8 = vcmp.ge.f32.partialorder %v668_v4, 0.0 }
 0x1da   : > { %720 = vst [vmem:[%s1112_s9 + $0x30] sm:$0xff] %v708_v9  ;;  %v709_v11 = vsel %vm685_vm5, %v673_v61, %v697_v5  ;;  %v710_v12 = vsel %vm686_vm6, %v674_v62, %v698_v8  ;;  %v692_v13 = vmul.f32 0.2, %v668_v4  ;;  %v676_v14 = vadd.f32 %v664_v60, %v640_v63 }
 0x1db   : > { %721 = vst [vmem:[%s1112_s9 + $0x38] sm:$0xff] %v709_v11  ;;  %722 = vst [vmem:[%s1112_s9 + $0x40] sm:$0xff] %v710_v12  ;;  %v711_v15 = vsel %vm687_vm7, %v675_v3, %v699_v10  ;;  %v677_v16 = vadd.f32 %v664_v60, %v641_v0  ;;  %v635_v17 = vmul.f32 %v1102_v7, %v594_v1 }
 0x1dc   : > { %723 = vst [vmem:[%s1112_s9 + $0x48] sm:$0xff] %v711_v15  ;;  %v704_v18 = vsel %vm680_vm8, %v668_v4, %v692_v13  ;;  %vm688_vm9 = vcmp.ge.f32.partialorder %v676_v14, 0.0  ;;  %v700_v19 = vmul.f32 0.2, %v676_v14 }
 0x1dd   : > { %716 = vst [vmem:[%s1112_s9 + $0x10] sm:$0xff] %v704_v18  ;;  %vm689_vm10 = vcmp.ge.f32.partialorder %v677_v16, 0.0  ;;  %v701_v20 = vmul.f32 0.2, %v677_v16  ;;  %v671_v21 = vadd.f32 %v1106_v33, %v635_v17 }
 0x1de   : > { %v712_v6 = vsel %vm688_vm9, %v676_v14, %v700_v19 }
 0x1df   : > { %724 = vst [vmem:[%s1112_s9 + $0x50] sm:$0xff] %v712_v6  ;;  %v713_v22 = vsel %vm689_vm10, %v677_v16, %v701_v20  ;;  %vm683_vm11 = vcmp.ge.f32.partialorder %v671_v21, 0.0  ;;  %v695_v23 = vmul.f32 0.2, %v671_v21 }
 0x1e0   : > { %725 = vst [vmem:[%s1112_s9 + $0x58] sm:$0xff] %v713_v22 }
 0x1e1   : > { %v707_v24 = vsel %vm683_vm11, %v671_v21, %v695_v23 }
 0x1e2   : > { %719 = vst [vmem:[%s1112_s9 + $0x28] sm:$0xff] %v707_v24 }
 0x1e3 PF: > { %s14_s15 = sadd.s32 1, %s867_s15  }
 0x1e4   : > { %p11_p4 = scmp.ge.s32.totalorder %s14_s15, 4  }
 0x1e6   :  { %13 = sbr.rel (!%p11_p4) target bundleno = 1 (0x1), region = 66 }

</bundles_post_ra>
